<compile_context>
chip_gen: v7x
topology: tpu7x:2x2x1
jax: 0.10.0
libtpu: 0.0.40
codegen_flags: <defaults>
</compile_context>

<pallas_src>
import math

import jax
import jax.numpy as jnp
from jax.experimental import pallas as pl
from jax.experimental.pallas import tpu as pltpu


_HIDDEN = (128, 256, 256, 128, 64)      # hidden widths of the reference module
_LANE = 128                             # TPU lane width: pad final output lane-dense
_NEG_BIG = -1e30                        # bias for padded output lanes -> exp() == 0
_VMEM_LIMIT = 48 * 1024 * 1024          # fits v7x 64 MiB/TC with headroom


def _round_up(x, m):
    return (x + m - 1) // m * m


def _make_mlp_softmax_kernel(num_layers):
    """Fused MLP (ReLU between layers) + softmax over the feature (lane) axis."""

    def kernel(*refs):
        x_ref, out_ref = refs[0], refs[-1]
        w_refs = refs[1:-1:2]
        b_refs = refs[2:-1:2]

        # ---- Layer 1: K = in_channels (tiny). A padded MXU pass would waste ~97%
        # of the contraction, so do unrolled f32 broadcast-FMAs on the VPU.
        x = x_ref[...]                              # (tb, in_ch) f32
        w1 = w_refs[0][...]                         # (in_ch, 128) f32
        y = x[:, 0:1] * w1[0:1, :]
        for k in range(1, x.shape[-1]):
            y = y + x[:, k:k + 1] * w1[k:k + 1, :]
        h = jnp.maximum(y + b_refs[0][...], 0.0).astype(jnp.bfloat16)

        # ---- Hidden layers: bf16 MXU matmuls, f32 accumulation / bias / ReLU.
        for li in range(1, num_layers - 1):
            y = jnp.dot(h, w_refs[li][...], preferred_element_type=jnp.float32)
            h = jnp.maximum(y + b_refs[li][...], 0.0).astype(jnp.bfloat16)

        # ---- Final layer (lane-padded to 128). Padded lanes carry a -1e30 bias,
        # so exp() flushes them to exactly 0: they never affect max, sum, or the
        # valid probabilities.
        logits = jnp.dot(h, w_refs[-1][...],
                         preferred_element_type=jnp.float32) + b_refs[-1][...]
        m = jnp.max(logits, axis=-1, keepdims=True)
        e = jnp.exp(logits - m)
        s = jnp.sum(e, axis=-1, keepdims=True)
        # approx reciprocal lowers to the EUP vrcp slot (free); rel. err ~2^-12.
        out_ref[...] = (e * pl.reciprocal(s, approx=True)).astype(out_ref.dtype)

    return kernel


def multi_channel_color_cnn(x, params, *, block_batch=1024):
    """x: (B, in_channels) f32; params: list of (W, b) with W stored as (in, out)."""
    B, in_channels = x.shape
    num_layers = len(params)
    out_channels = params[-1][0].shape[1]
    padded_out = _round_up(max(out_channels, _LANE), _LANE)

    # Batch tile: multiple of 16 (bf16 LHS sublane packing). If the whole batch
    # fits one tile but can be split (>=32 rows), force >=2 grid steps so the
    # "parallel" axis can shard across both v7x TensorCores.
    b16 = _round_up(B, 16)
    tb = _round_up(min(block_batch, b16), 16)
    if b16 >= 32 and b16 <= tb:
        tb = _round_up((b16 + 1) // 2, 16)
    b_pad = _round_up(B, tb)
    if b_pad != B:
        x = jnp.pad(x, ((0, b_pad - B), (0, 0)))

    # Operands: layer-1 weights stay f32 (VPU-FMA path), later weights bf16 (MXU),
    # all biases f32 (1, out). Final layer lane-padded to padded_out.
    flat_inputs = [x]
    for idx, (w, b) in enumerate(params):
        b = b.astype(jnp.float32)
        w = w.astype(jnp.float32 if idx == 0 else jnp.bfloat16)
        if idx == num_layers - 1:
            w = jnp.pad(w, ((0, 0), (0, padded_out - out_channels)))
            b = jnp.pad(b, (0, padded_out - out_channels), constant_values=_NEG_BIG)
        flat_inputs.append(w)
        flat_inputs.append(b.reshape(1, -1))

    grid = (b_pad // tb,)
    in_specs = [pl.BlockSpec((tb, in_channels), lambda i: (i, 0))]
    for arr in flat_inputs[1:]:
        # Full-array blocks with constant index maps: weights/biases stay
        # VMEM-resident across all grid steps (no per-step re-DMA).
        in_specs.append(pl.BlockSpec(arr.shape, lambda i: (0, 0)))
    out_specs = pl.BlockSpec((tb, padded_out), lambda i: (i, 0))

    # Advisory cost estimate; dims derived from the actual params.
    dims = [in_channels] + [w.shape[1] for (w, _) in params[:-1]] + [padded_out]
    flops = 2 * b_pad * sum(dims[i] * dims[i + 1] for i in range(len(dims) - 1))
    weight_bytes = int(sum(int(a.size) * a.dtype.itemsize for a in flat_inputs[1:]))
    bytes_accessed = int(x.size * x.dtype.itemsize
                         + b_pad * padded_out * 2      # bf16 output writeback
                         + weight_bytes)
    cost = pl.CostEstimate(flops=int(flops),
                           transcendentals=int(b_pad * padded_out),
                           bytes_accessed=bytes_accessed)

    out = pl.pallas_call(
        _make_mlp_softmax_kernel(num_layers),
        out_shape=jax.ShapeDtypeStruct((b_pad, padded_out), jnp.bfloat16),
        grid=grid,
        in_specs=in_specs,
        out_specs=out_specs,
        compiler_params=pltpu.CompilerParams(
            dimension_semantics=("parallel",),
            vmem_limit_bytes=_VMEM_LIMIT),
        cost_estimate=cost,
    )(*flat_inputs)

    # bf16 lane-dense writeback halves HBM store traffic; slice/cast back here.
    return out[:B, :out_channels].astype(jnp.float32)


def init_params(key, in_channels, out_channels):
    """Mirror nn.Linear default init U(-1/sqrt(fan_in), 1/sqrt(fan_in)).
    Weights are stored transposed as (fan_in, fan_out)."""
    dims = [in_channels, *_HIDDEN, out_channels]
    params = []
    for i in range(len(dims) - 1):
        fan_in, fan_out = dims[i], dims[i + 1]
        key, kw, kb = jax.random.split(key, 3)
        bound = 1.0 / math.sqrt(fan_in)
        w = jax.random.uniform(kw, (fan_in, fan_out), jnp.float32, -bound, bound)
        b = jax.random.uniform(kb, (fan_out,), jnp.float32, -bound, bound)
        params.append((w, b))
    return params


if __name__ == "__main__":
    key = jax.random.PRNGKey(0)
    in_channels, out_channels = 4, 4
    batch = 8

    key, kx = jax.random.split(key)
    x = jax.random.normal(kx, (batch, in_channels), jnp.float32)
    params = init_params(key, in_channels, out_channels)

    out = multi_channel_color_cnn(x, params)
    out = jax.block_until_ready(out)
    assert out.shape == (batch, out_channels)

    # softmax rows sum to ~1 (bf16 writeback + approx reciprocal tolerances)
    row_sums = jnp.sum(out, axis=1)
    assert bool(jnp.all(jnp.abs(row_sums - 1.0) < 1e-2))

    # Reference mirroring the kernel's mixed precision (f32 layer 1, bf16 MXU layers).
    def ref_mixed(x, params):
        w1, b1 = params[0]
        h = jnp.maximum(x @ w1 + b1, 0.0).astype(jnp.bfloat16)
        for (w, b) in params[1:-1]:
            y = jnp.dot(h, w.astype(jnp.bfloat16),
                        preferred_element_type=jnp.float32) + b
            h = jnp.maximum(y, 0.0).astype(jnp.bfloat16)
        w, b = params[-1]
        logits = jnp.dot(h, w.astype(jnp.bfloat16),
                         preferred_element_type=jnp.float32) + b
        return jax.nn.softmax(logits, axis=1)

    def ref_f32(x, params):
        h = x
        for (w, b) in params[:-1]:
            h = jnp.maximum(h @ w + b, 0.0)
        w, b = params[-1]
        return jax.nn.softmax(h @ w + b, axis=1)

    exp_mixed = ref_mixed(x, params)
    exp_f32 = ref_f32(x, params)
    assert bool(jnp.all(jnp.abs(out - exp_mixed) < 1e-2)), "mismatch vs mixed-precision reference"
    assert bool(jnp.all(jnp.abs(out - exp_f32) < 5e-2)), "drift vs f32 reference"

    print("KERNEL_OK")
</pallas_src>

<mosaic_0001>
module attributes {stable_mosaic.version = 11 : i64} {
  func.func @kernel(%arg0: i32, %arg1: memref<16x4xf32, #tpu.memory_space<vmem>>, %arg2: memref<4x128xf32, #tpu.memory_space<vmem>>, %arg3: memref<1x128xf32, #tpu.memory_space<vmem>>, %arg4: memref<128x256xbf16, #tpu.memory_space<vmem>>, %arg5: memref<1x256xf32, #tpu.memory_space<vmem>>, %arg6: memref<256x256xbf16, #tpu.memory_space<vmem>>, %arg7: memref<1x256xf32, #tpu.memory_space<vmem>>, %arg8: memref<256x128xbf16, #tpu.memory_space<vmem>>, %arg9: memref<1x128xf32, #tpu.memory_space<vmem>>, %arg10: memref<128x64xbf16, #tpu.memory_space<vmem>>, %arg11: memref<1x64xf32, #tpu.memory_space<vmem>>, %arg12: memref<64x128xbf16, #tpu.memory_space<vmem>>, %arg13: memref<1x128xf32, #tpu.memory_space<vmem>>, %arg14: memref<16x128xbf16, #tpu.memory_space<vmem>>) attributes {dimension_semantics = [#tpu.dimension_semantics<parallel>], iteration_bounds = array<i64: 1>, scalar_prefetch = 0 : i64, scratch_operands = 0 : i64, tpu.core_type = #tpu.core_type<tc>, window_params = [{transform_indices = @transform_0, window_bounds = array<i64: 16, 4>}, {pipeline_mode = #tpu.pipeline_mode<synchronous>, transform_indices = @transform_1, window_bounds = array<i64: 4, 128>}, {pipeline_mode = #tpu.pipeline_mode<synchronous>, transform_indices = @transform_2, window_bounds = array<i64: 1, 128>}, {pipeline_mode = #tpu.pipeline_mode<synchronous>, transform_indices = @transform_3, window_bounds = array<i64: 128, 256>}, {pipeline_mode = #tpu.pipeline_mode<synchronous>, transform_indices = @transform_4, window_bounds = array<i64: 1, 256>}, {pipeline_mode = #tpu.pipeline_mode<synchronous>, transform_indices = @transform_5, window_bounds = array<i64: 256, 256>}, {pipeline_mode = #tpu.pipeline_mode<synchronous>, transform_indices = @transform_6, window_bounds = array<i64: 1, 256>}, {pipeline_mode = #tpu.pipeline_mode<synchronous>, transform_indices = @transform_7, window_bounds = array<i64: 256, 128>}, {pipeline_mode = #tpu.pipeline_mode<synchronous>, transform_indices = @transform_8, window_bounds = array<i64: 1, 128>}, {pipeline_mode = #tpu.pipeline_mode<synchronous>, transform_indices = @transform_9, window_bounds = array<i64: 128, 64>}, {pipeline_mode = #tpu.pipeline_mode<synchronous>, transform_indices = @transform_10, window_bounds = array<i64: 1, 64>}, {pipeline_mode = #tpu.pipeline_mode<synchronous>, transform_indices = @transform_11, window_bounds = array<i64: 64, 128>}, {pipeline_mode = #tpu.pipeline_mode<synchronous>, transform_indices = @transform_12, window_bounds = array<i64: 1, 128>}, {transform_indices = @transform_13, window_bounds = array<i64: 16, 128>}]} {
    %c0 = arith.constant 0 : index
    %c0_0 = arith.constant 0 : index
    %0 = vector.load %arg1[%c0, %c0_0] : memref<16x4xf32, #tpu.memory_space<vmem>>, vector<16x4xf32>
    %c0_1 = arith.constant 0 : index
    %c0_2 = arith.constant 0 : index
    %1 = vector.load %arg2[%c0_1, %c0_2] : memref<4x128xf32, #tpu.memory_space<vmem>>, vector<4x128xf32>
    %2 = vector.extract_strided_slice %0 {offsets = [0, 0], sizes = [16, 1], strides = [1, 1]} : vector<16x4xf32> to vector<16x1xf32>
    %3 = vector.extract_strided_slice %1 {offsets = [0, 0], sizes = [1, 128], strides = [1, 1]} : vector<4x128xf32> to vector<1x128xf32>
    %4 = vector.broadcast %2 : vector<16x1xf32> to vector<16x128xf32>
    %5 = vector.broadcast %3 : vector<1x128xf32> to vector<16x128xf32>
    %6 = arith.mulf %4, %5 : vector<16x128xf32>
    %7 = vector.extract_strided_slice %0 {offsets = [0, 1], sizes = [16, 1], strides = [1, 1]} : vector<16x4xf32> to vector<16x1xf32>
    %8 = vector.extract_strided_slice %1 {offsets = [1, 0], sizes = [1, 128], strides = [1, 1]} : vector<4x128xf32> to vector<1x128xf32>
    %9 = vector.broadcast %7 : vector<16x1xf32> to vector<16x128xf32>
    %10 = vector.broadcast %8 : vector<1x128xf32> to vector<16x128xf32>
    %11 = arith.mulf %9, %10 : vector<16x128xf32>
    %12 = arith.addf %6, %11 : vector<16x128xf32>
    %13 = vector.extract_strided_slice %0 {offsets = [0, 2], sizes = [16, 1], strides = [1, 1]} : vector<16x4xf32> to vector<16x1xf32>
    %14 = vector.extract_strided_slice %1 {offsets = [2, 0], sizes = [1, 128], strides = [1, 1]} : vector<4x128xf32> to vector<1x128xf32>
    %15 = vector.broadcast %13 : vector<16x1xf32> to vector<16x128xf32>
    %16 = vector.broadcast %14 : vector<1x128xf32> to vector<16x128xf32>
    %17 = arith.mulf %15, %16 : vector<16x128xf32>
    %18 = arith.addf %12, %17 : vector<16x128xf32>
    %19 = vector.extract_strided_slice %0 {offsets = [0, 3], sizes = [16, 1], strides = [1, 1]} : vector<16x4xf32> to vector<16x1xf32>
    %20 = vector.extract_strided_slice %1 {offsets = [3, 0], sizes = [1, 128], strides = [1, 1]} : vector<4x128xf32> to vector<1x128xf32>
    %21 = vector.broadcast %19 : vector<16x1xf32> to vector<16x128xf32>
    %22 = vector.broadcast %20 : vector<1x128xf32> to vector<16x128xf32>
    %23 = arith.mulf %21, %22 : vector<16x128xf32>
    %24 = arith.addf %18, %23 : vector<16x128xf32>
    %c0_3 = arith.constant 0 : index
    %c0_4 = arith.constant 0 : index
    %25 = vector.load %arg3[%c0_3, %c0_4] : memref<1x128xf32, #tpu.memory_space<vmem>>, vector<1x128xf32>
    %26 = vector.broadcast %25 : vector<1x128xf32> to vector<16x128xf32>
    %27 = arith.addf %24, %26 : vector<16x128xf32>
    %cst = arith.constant 0.000000e+00 : f32
    %28 = vector.broadcast %cst : f32 to vector<16x128xf32>
    %29 = arith.maximumf %27, %28 : vector<16x128xf32>
    %30 = arith.truncf %29 : vector<16x128xf32> to vector<16x128xbf16>
    %c0_5 = arith.constant 0 : index
    %c0_6 = arith.constant 0 : index
    %31 = vector.load %arg4[%c0_5, %c0_6] : memref<128x256xbf16, #tpu.memory_space<vmem>>, vector<128x256xbf16>
    %cst_7 = arith.constant dense<0.000000e+00> : vector<16x256xf32>
    %32 = tpu.matmul %30, %31, %cst_7 {dimension_numbers = #tpu.dot_dimension_numbers<[1], [0], [0], [1], [0, 0, 1, 1], [], []>} : vector<16x128xbf16>, vector<128x256xbf16>, vector<16x256xf32> -> vector<16x256xf32>
    %c0_8 = arith.constant 0 : index
    %c0_9 = arith.constant 0 : index
    %33 = vector.load %arg5[%c0_8, %c0_9] : memref<1x256xf32, #tpu.memory_space<vmem>>, vector<1x256xf32>
    %34 = vector.broadcast %33 : vector<1x256xf32> to vector<16x256xf32>
    %35 = arith.addf %32, %34 : vector<16x256xf32>
    %cst_10 = arith.constant 0.000000e+00 : f32
    %36 = vector.broadcast %cst_10 : f32 to vector<16x256xf32>
    %37 = arith.maximumf %35, %36 : vector<16x256xf32>
    %38 = arith.truncf %37 : vector<16x256xf32> to vector<16x256xbf16>
    %c0_11 = arith.constant 0 : index
    %c0_12 = arith.constant 0 : index
    %39 = vector.load %arg6[%c0_11, %c0_12] : memref<256x256xbf16, #tpu.memory_space<vmem>>, vector<256x256xbf16>
    %cst_13 = arith.constant dense<0.000000e+00> : vector<16x256xf32>
    %40 = tpu.matmul %38, %39, %cst_13 {dimension_numbers = #tpu.dot_dimension_numbers<[1], [0], [0], [1], [0, 0, 1, 1], [], []>} : vector<16x256xbf16>, vector<256x256xbf16>, vector<16x256xf32> -> vector<16x256xf32>
    %c0_14 = arith.constant 0 : index
    %c0_15 = arith.constant 0 : index
    %41 = vector.load %arg7[%c0_14, %c0_15] : memref<1x256xf32, #tpu.memory_space<vmem>>, vector<1x256xf32>
    %42 = vector.broadcast %41 : vector<1x256xf32> to vector<16x256xf32>
    %43 = arith.addf %40, %42 : vector<16x256xf32>
    %cst_16 = arith.constant 0.000000e+00 : f32
    %44 = vector.broadcast %cst_16 : f32 to vector<16x256xf32>
    %45 = arith.maximumf %43, %44 : vector<16x256xf32>
    %46 = arith.truncf %45 : vector<16x256xf32> to vector<16x256xbf16>
    %c0_17 = arith.constant 0 : index
    %c0_18 = arith.constant 0 : index
    %47 = vector.load %arg8[%c0_17, %c0_18] : memref<256x128xbf16, #tpu.memory_space<vmem>>, vector<256x128xbf16>
    %cst_19 = arith.constant dense<0.000000e+00> : vector<16x128xf32>
    %48 = tpu.matmul %46, %47, %cst_19 {dimension_numbers = #tpu.dot_dimension_numbers<[1], [0], [0], [1], [0, 0, 1, 1], [], []>} : vector<16x256xbf16>, vector<256x128xbf16>, vector<16x128xf32> -> vector<16x128xf32>
    %c0_20 = arith.constant 0 : index
    %c0_21 = arith.constant 0 : index
    %49 = vector.load %arg9[%c0_20, %c0_21] : memref<1x128xf32, #tpu.memory_space<vmem>>, vector<1x128xf32>
    %50 = vector.broadcast %49 : vector<1x128xf32> to vector<16x128xf32>
    %51 = arith.addf %48, %50 : vector<16x128xf32>
    %cst_22 = arith.constant 0.000000e+00 : f32
    %52 = vector.broadcast %cst_22 : f32 to vector<16x128xf32>
    %53 = arith.maximumf %51, %52 : vector<16x128xf32>
    %54 = arith.truncf %53 : vector<16x128xf32> to vector<16x128xbf16>
    %c0_23 = arith.constant 0 : index
    %c0_24 = arith.constant 0 : index
    %55 = vector.load %arg10[%c0_23, %c0_24] : memref<128x64xbf16, #tpu.memory_space<vmem>>, vector<128x64xbf16>
    %cst_25 = arith.constant dense<0.000000e+00> : vector<16x64xf32>
    %56 = tpu.matmul %54, %55, %cst_25 {dimension_numbers = #tpu.dot_dimension_numbers<[1], [0], [0], [1], [0, 0, 1, 1], [], []>} : vector<16x128xbf16>, vector<128x64xbf16>, vector<16x64xf32> -> vector<16x64xf32>
    %c0_26 = arith.constant 0 : index
    %c0_27 = arith.constant 0 : index
    %57 = vector.load %arg11[%c0_26, %c0_27] : memref<1x64xf32, #tpu.memory_space<vmem>>, vector<1x64xf32>
    %58 = vector.broadcast %57 : vector<1x64xf32> to vector<16x64xf32>
    %59 = arith.addf %56, %58 : vector<16x64xf32>
    %cst_28 = arith.constant 0.000000e+00 : f32
    %60 = vector.broadcast %cst_28 : f32 to vector<16x64xf32>
    %61 = arith.maximumf %59, %60 : vector<16x64xf32>
    %62 = arith.truncf %61 : vector<16x64xf32> to vector<16x64xbf16>
    %c0_29 = arith.constant 0 : index
    %c0_30 = arith.constant 0 : index
    %63 = vector.load %arg12[%c0_29, %c0_30] : memref<64x128xbf16, #tpu.memory_space<vmem>>, vector<64x128xbf16>
    %cst_31 = arith.constant dense<0.000000e+00> : vector<16x128xf32>
    %64 = tpu.matmul %62, %63, %cst_31 {dimension_numbers = #tpu.dot_dimension_numbers<[1], [0], [0], [1], [0, 0, 1, 1], [], []>} : vector<16x64xbf16>, vector<64x128xbf16>, vector<16x128xf32> -> vector<16x128xf32>
    %c0_32 = arith.constant 0 : index
    %c0_33 = arith.constant 0 : index
    %65 = vector.load %arg13[%c0_32, %c0_33] : memref<1x128xf32, #tpu.memory_space<vmem>>, vector<1x128xf32>
    %66 = vector.broadcast %65 : vector<1x128xf32> to vector<16x128xf32>
    %67 = arith.addf %64, %66 : vector<16x128xf32>
    %cst_34 = arith.constant dense<0xFF800000> : vector<16xf32>
    %68 = vector.multi_reduction <maximumf>, %67, %cst_34 [1] : vector<16x128xf32> to vector<16xf32>
    %69 = vector.shape_cast %68 : vector<16xf32> to vector<16x1xf32>
    %70 = vector.broadcast %69 : vector<16x1xf32> to vector<16x128xf32>
    %71 = arith.subf %67, %70 : vector<16x128xf32>
    %72 = math.exp %71 : vector<16x128xf32>
    %cst_35 = arith.constant dense<0.000000e+00> : vector<16xf32>
    %73 = vector.multi_reduction <add>, %72, %cst_35 [1] : vector<16x128xf32> to vector<16xf32>
    %74 = vector.shape_cast %73 : vector<16xf32> to vector<16x1xf32>
    %75 = tpu.reciprocal %74 {approx = true} : vector<16x1xf32> -> vector<16x1xf32>
    %76 = vector.broadcast %75 : vector<16x1xf32> to vector<16x128xf32>
    %77 = arith.mulf %72, %76 : vector<16x128xf32>
    %78 = arith.truncf %77 : vector<16x128xf32> to vector<16x128xbf16>
    %c0_36 = arith.constant 0 : index
    %c0_37 = arith.constant 0 : index
    %79 = vector.load %arg14[%c0_36, %c0_37] : memref<16x128xbf16, #tpu.memory_space<vmem>>, vector<16x128xbf16>
    tpu.vector_store %arg14[%c0_36, %c0_37], %78 {strides = array<i32>} : memref<16x128xbf16, #tpu.memory_space<vmem>>, vector<16x128xbf16>,
    return
  }
  func.func @transform_0(%arg0: i32) -> (i32, i32) {
    %c0_i32 = arith.constant 0 : i32
    %c0_i32_0 = arith.constant 0 : i32
    return %arg0, %c0_i32 : i32, i32
  }
  func.func @transform_1(%arg0: i32) -> (i32, i32) {
    %c0_i32 = arith.constant 0 : i32
    %c0_i32_0 = arith.constant 0 : i32
    %c0_i32_1 = arith.constant 0 : i32
    return %c0_i32, %c0_i32_0 : i32, i32
  }
  func.func @transform_2(%arg0: i32) -> (i32, i32) {
    %c0_i32 = arith.constant 0 : i32
    %c0_i32_0 = arith.constant 0 : i32
    %c0_i32_1 = arith.constant 0 : i32
    return %c0_i32, %c0_i32_0 : i32, i32
  }
  func.func @transform_3(%arg0: i32) -> (i32, i32) {
    %c0_i32 = arith.constant 0 : i32
    %c0_i32_0 = arith.constant 0 : i32
    %c0_i32_1 = arith.constant 0 : i32
    return %c0_i32, %c0_i32_0 : i32, i32
  }
  func.func @transform_4(%arg0: i32) -> (i32, i32) {
    %c0_i32 = arith.constant 0 : i32
    %c0_i32_0 = arith.constant 0 : i32
    %c0_i32_1 = arith.constant 0 : i32
    return %c0_i32, %c0_i32_0 : i32, i32
  }
  func.func @transform_5(%arg0: i32) -> (i32, i32) {
    %c0_i32 = arith.constant 0 : i32
    %c0_i32_0 = arith.constant 0 : i32
    %c0_i32_1 = arith.constant 0 : i32
    return %c0_i32, %c0_i32_0 : i32, i32
  }
  func.func @transform_6(%arg0: i32) -> (i32, i32) {
    %c0_i32 = arith.constant 0 : i32
    %c0_i32_0 = arith.constant 0 : i32
    %c0_i32_1 = arith.constant 0 : i32
    return %c0_i32, %c0_i32_0 : i32, i32
  }
  func.func @transform_7(%arg0: i32) -> (i32, i32) {
    %c0_i32 = arith.constant 0 : i32
    %c0_i32_0 = arith.constant 0 : i32
    %c0_i32_1 = arith.constant 0 : i32
    return %c0_i32, %c0_i32_0 : i32, i32
  }
  func.func @transform_8(%arg0: i32) -> (i32, i32) {
    %c0_i32 = arith.constant 0 : i32
    %c0_i32_0 = arith.constant 0 : i32
    %c0_i32_1 = arith.constant 0 : i32
    return %c0_i32, %c0_i32_0 : i32, i32
  }
  func.func @transform_9(%arg0: i32) -> (i32, i32) {
    %c0_i32 = arith.constant 0 : i32
    %c0_i32_0 = arith.constant 0 : i32
    %c0_i32_1 = arith.constant 0 : i32
    return %c0_i32, %c0_i32_0 : i32, i32
  }
  func.func @transform_10(%arg0: i32) -> (i32, i32) {
    %c0_i32 = arith.constant 0 : i32
    %c0_i32_0 = arith.constant 0 : i32
    %c0_i32_1 = arith.constant 0 : i32
    return %c0_i32, %c0_i32_0 : i32, i32
  }
  func.func @transform_11(%arg0: i32) -> (i32, i32) {
    %c0_i32 = arith.constant 0 : i32
    %c0_i32_0 = arith.constant 0 : i32
    %c0_i32_1 = arith.constant 0 : i32
    return %c0_i32, %c0_i32_0 : i32, i32
  }
  func.func @transform_12(%arg0: i32) -> (i32, i32) {
    %c0_i32 = arith.constant 0 : i32
    %c0_i32_0 = arith.constant 0 : i32
    %c0_i32_1 = arith.constant 0 : i32
    return %c0_i32, %c0_i32_0 : i32, i32
  }
  func.func @transform_13(%arg0: i32) -> (i32, i32) {
    %c0_i32 = arith.constant 0 : i32
    %c0_i32_0 = arith.constant 0 : i32
    return %arg0, %c0_i32 : i32, i32
  }
}

</mosaic_0001>

<bundles_post_ra>
// kernel: tpu_custom_call.1
= control target key start
LH: loop header
LB: loop body
LE: loop exit
PB: predicated region body
PF: predicated region fallthrough
CT: control target
= control target key end

     0   :  { %18 = vsyncpa [#allocation3], 0  ;;  %s1648_s0 = inlined_call_operand.vmem [shape: f32[16,4], index: 0, kind: input, shape index: {}]   ;;  %s1649_s1 = inlined_call_operand.vmem [shape: f32[4,128], index: 1, kind: input, shape index: {}]   ;;  %s1650_s2 = inlined_call_operand.vmem [shape: f32[1,128], index: 2, kind: input, shape index: {}]   ;;  %s1651_s3 = inlined_call_operand.hbm [shape: bf16[128,256], index: 3, kind: input, shape index: {}]   ;;  %s1652_s4 = inlined_call_operand.vmem [shape: f32[1,256], index: 4, kind: input, shape index: {}]   ;;  %s1653_s5 = inlined_call_operand.hbm [shape: bf16[256,256], index: 5, kind: input, shape index: {}]   ;;  %s1654_s6 = inlined_call_operand.vmem [shape: f32[1,256], index: 6, kind: input, shape index: {}]   ;;  %s1655_s7 = inlined_call_operand.vmem [shape: bf16[256,128], index: 7, kind: input, shape index: {}]   ;;  %s1656_s8 = inlined_call_operand.vmem [shape: f32[1,128], index: 8, kind: input, shape index: {}]   ;;  %s1657_s9 = inlined_call_operand.vmem [shape: bf16[128,64], index: 9, kind: input, shape index: {}]   ;;  %s1658_s10 = inlined_call_operand.vmem [shape: f32[1,64], index: 10, kind: input, shape index: {}]   ;;  %s1659_s11 = inlined_call_operand.hbm [shape: bf16[64,128], index: 11, kind: input, shape index: {}]   ;;  %s1660_s12 = inlined_call_operand.vmem [shape: f32[1,128], index: 12, kind: input, shape index: {}]   ;;  %s1661_s13 = inlined_call_operand.hbm [shape: bf16[16,128], index: 13, kind: output, shape index: {}]  }
   0x1   :  { %19 = vsyncpa [#allocation6], 0 }
   0x2   :  { %20 = vsyncpa [#allocation4], 0  ;;  %s1380_s25 = smov [#allocation5]   ;;  %s1381_s27 = smov [#allocation2]  }
   0x3   :  { %s46_s26 = sshll.u32 %s1380_s25, 4  ;;  %s32_s28 = sshll.u32 %s1381_s27, 4  ;;  %s47_s26 = int_to_ptr.vmem [resolvable:$true] %s46_s26  ;;  %s1464_s28 = int_to_ptr.vmem [resolvable:$true] %s32_s28 }
   0x4   :  { %s1286_s14 = scalar_lea.hbm %s1653_s5, 4096 }
   0x5   :  { %p1287_p0 = scmp.ne.s32.totalorder %s1653_s5, %s1286_s14  ;;  %p1290_p1 = scmp.lt.u32.totalorder %s1286_s14, %s1653_s5 }
   0x7   :  { %p1292_p2 = pnand %p1290_p1, %p1287_p0 }
   0x9   :  { %1295 = shalt.err (!%p1292_p2)
}
   0xa   :  { %s1296_s19 = scalar_lea.vmem %s47_s26, 4096  ;;  %p1301_p4 = scmp.lt.s32.totalorder %s47_s26, %s47_s26 }
   0xb   :  { %p1297_p3 = scmp.ne.s32.totalorder %s47_s26, %s1296_s19  ;;  %p1302_p5 = scmp.lt.s32.totalorder %s1296_s19, %s1296_s19 }
   0xd   :  { %p1303_p6 = por %p1302_p5, %p1301_p4 }
   0xf   :  { %p1304_p7 = pnand %p1303_p6, %p1297_p3 }
  0x11   :  { %1307 = shalt.err (!%p1304_p7)
}
  0x12   :  { %s1382_s20 = smov 128   ;;  %s1383_s21 = smov 8  }
  0x13   :  { %52 = dma.hbm_to_vmem [thread:$0]  %s1653_s5, 4096, %s47_s26, [#allocation6], %s1382_s20, %s1382_s20, %s1383_s21  }
  0x14   :  { %s1308_s27 = scalar_lea.hbm %s1651_s3, 2048 }
  0x15   :  { %p1309_p8 = scmp.ne.s32.totalorder %s1651_s3, %s1308_s27  ;;  %p1312_p9 = scmp.lt.u32.totalorder %s1308_s27, %s1651_s3 }
  0x17   :  { %p1314_p10 = pnand %p1312_p9, %p1309_p8 }
  0x19   :  { %1317 = shalt.err (!%p1314_p10)
}
  0x1a   :  { %s1318_s16 = scalar_lea.vmem %s1464_s28, 2048  ;;  %p1323_p12 = scmp.lt.s32.totalorder %s1464_s28, %s1464_s28 }
  0x1b   :  { %p1319_p11 = scmp.ne.s32.totalorder %s1464_s28, %s1318_s16  ;;  %p1324_p13 = scmp.lt.s32.totalorder %s1318_s16, %s1318_s16 }
  0x1d   :  { %p1325_p0 = por %p1324_p13, %p1323_p12 }
  0x1f   :  { %p1326_p1 = pnand %p1325_p0, %p1319_p11 }
  0x21   :  { %1329 = shalt.err (!%p1326_p1)
}
  0x22   :  { %38 = dma.hbm_to_vmem [thread:$0]  %s1651_s3, 2048, %s1464_s28, [#allocation3], %s1382_s20, %s1382_s20, %s1383_s21  }
  0x23   :  { %s1384_s17 = smov [#allocation7]   ;;  %s1330_s23 = scalar_lea.hbm %s1659_s11, 512 }
  0x24   :  { %s68_s18 = sshll.u32 %s1384_s17, 4  ;;  %p1331_p2 = scmp.ne.s32.totalorder %s1659_s11, %s1330_s23  ;;  %s69_s18 = int_to_ptr.vmem [resolvable:$true] %s68_s18 }
  0x25   :  { %p1334_p3 = scmp.lt.u32.totalorder %s1330_s23, %s1659_s11 }
  0x27   :  { %p1336_p4 = pnand %p1334_p3, %p1331_p2 }
  0x29   :  { %1339 = shalt.err (!%p1336_p4)
}
  0x2a   :  { %s1340_s30 = scalar_lea.vmem %s69_s18, 512  ;;  %p1345_p6 = scmp.lt.s32.totalorder %s69_s18, %s69_s18 }
  0x2b   :  { %p1341_p5 = scmp.ne.s32.totalorder %s69_s18, %s1340_s30  ;;  %p1346_p7 = scmp.lt.s32.totalorder %s1340_s30, %s1340_s30 }
  0x2d   :  { %p1347_p8 = por %p1346_p7, %p1345_p6 }
  0x2f   :  { %p1348_p9 = pnand %p1347_p8, %p1341_p5 }
  0x31   :  { %1351 = shalt.err (!%p1348_p9)
}
  0x32   :  { %s1385_s3 = smov 64   ;;  %s1386_s28 = smov 4  }
  0x33   :  { %74 = dma.hbm_to_vmem [thread:$0]  %s1659_s11, 512, %s69_s18, [#allocation6], %s1385_s3, %s1385_s3, %s1386_s28  }
  0x34   :  { %1374 = dma.done.wait [#allocation3], 2048  }
  0x35   :  { %1375 = vsyncadd [#allocation3], 4294965248 }
  0x36   :  { %1376 = dma.done.wait [#allocation6], 4608  }
  0x37   :  { %1377 = vsyncadd [#allocation6], 4294962688  ;;  %v1387_v0 = vmov 1   ;;  %v1388_v1 = vmov 0   ;;  %v87_v2 = vld [vmem:[%s1648_s0] sm:$0xff]  ;;  %v88_v3 = vld [vmem:[%s1648_s0 + $0x8] sm:$0xff]  ;;  %v100_v49 = vlaneseq }
  0x38   :  { %1173 = vset.pattern.permute.xlu1 %v1387_v0  ;;  %1172 = vset.pattern.permute.xlu0 %v1388_v1  ;;  %v1178_v4 = vld [vmem:[#allocation2 + $0x4] ss:$8 sps:$4 sm:$0xff]   ;;  %v1180_v5 = vld [vmem:[#allocation2] ss:$8 sps:$4 sm:$0xff]   ;;  %v1181_v6 = vld [vmem:[#allocation2 + $0x14] ss:$8 sps:$4 sm:$0xff]  }
  0x39   :  { %306 = vmatprep.mubr.bf16.mxu0 %v1388_v1  ;;  %107 = vperm.xlu1 %1173, %v87_v2   ;;  %v1183_v7 = vld [vmem:[#allocation2 + $0x10] ss:$8 sps:$4 sm:$0xff]   ;;  %v1184_v8 = vld [vmem:[#allocation2 + $0x24] ss:$8 sps:$4 sm:$0xff]   ;;  %v1186_v9 = vld [vmem:[#allocation2 + $0x20] ss:$8 sps:$4 sm:$0xff]  }
  0x3a   :  { %92 = vperm.xlu0 %1172, %v87_v2   ;;  %274 = vmatprep.subr.bf16.mxu0 %v1178_v4  ;;  %v1187_v10 = vld [vmem:[#allocation2 + $0x34] ss:$8 sps:$4 sm:$0xff]   ;;  %v1389_v11 = vmov 2   ;;  %v1189_v12 = vld [vmem:[#allocation2 + $0x30] ss:$8 sps:$4 sm:$0xff]   ;;  %v1390_v14 = vmov 3  }
  0x3b   :  { %275 = vmatpush1.bf16.msra.mxu0 %v1180_v5  ;;  %v1190_v13 = vld [vmem:[#allocation2 + $0x44] ss:$8 sps:$4 sm:$0xff]   ;;  %v1192_v15 = vld [vmem:[#allocation2 + $0x40] ss:$8 sps:$4 sm:$0xff]   ;;  %v1193_v16 = vld [vmem:[#allocation2 + $0x54] ss:$8 sps:$4 sm:$0xff]  }
  0x3c   :  { %276 = vmatprep.subr.bf16.mxu0 %v1181_v6  ;;  %v1195_v17 = vld [vmem:[#allocation2 + $0x50] ss:$8 sps:$4 sm:$0xff]   ;;  %v1196_v18 = vld [vmem:[#allocation2 + $0x64] ss:$8 sps:$4 sm:$0xff]   ;;  %v1198_v19 = vld [vmem:[#allocation2 + $0x60] ss:$8 sps:$4 sm:$0xff]  }
  0x3d   :  { %111 = vperm.xlu1 %1173, %v88_v3   ;;  %v1199_v20 = vld [vmem:[#allocation2 + $0x74] ss:$8 sps:$4 sm:$0xff]   ;;  %v1202_v21 = vld [vmem:[#allocation5 + $0x4] ss:$8 sps:$4 sm:$0xff]   ;;  %v1204_v22 = vld [vmem:[#allocation5] ss:$8 sps:$4 sm:$0xff]  }
  0x3e   :  { %97 = vperm.xlu0 %1172, %v88_v3   ;;  %v1205_v23 = vld [vmem:[#allocation5 + $0x14] ss:$8 sps:$4 sm:$0xff]   ;;  %527 = vmatprep.subr.bf16.mxu1 %v1202_v21  ;;  %v1201_v24 = vld [vmem:[#allocation2 + $0x70] ss:$8 sps:$4 sm:$0xff]   ;;  %v1208_v26 = vld [vmem:[#allocation5 + $0x24] ss:$8 sps:$4 sm:$0xff]  }
  0x3f   :  { %277 = vmatpush1.bf16.msra.mxu0 %v1183_v7  ;;  %528 = vmatpush1.bf16.msra.mxu1 %v1204_v22  ;;  %v1207_v25 = vld [vmem:[#allocation5 + $0x10] ss:$8 sps:$4 sm:$0xff]   ;;  %v1210_v27 = vld [vmem:[#allocation5 + $0x20] ss:$8 sps:$4 sm:$0xff]   ;;  %v1211_v28 = vld [vmem:[#allocation5 + $0x34] ss:$8 sps:$4 sm:$0xff]  }
  0x40   :  { %278 = vmatprep.subr.bf16.mxu0 %v1184_v8  ;;  %529 = vmatprep.subr.bf16.mxu1 %v1205_v23  ;;  %v1213_v29 = vld [vmem:[#allocation5 + $0x30] ss:$8 sps:$4 sm:$0xff]   ;;  %v1214_v30 = vld [vmem:[#allocation5 + $0x44] ss:$8 sps:$4 sm:$0xff]   ;;  %v1216_v31 = vld [vmem:[#allocation5 + $0x40] ss:$8 sps:$4 sm:$0xff]  }
  0x41   :  { %1175 = vset.pattern.permute.xlu1 %v1389_v11  ;;  %v1217_v32 = vld [vmem:[#allocation5 + $0x54] ss:$8 sps:$4 sm:$0xff]   ;;  %v1219_v33 = vld [vmem:[#allocation5 + $0x50] ss:$8 sps:$4 sm:$0xff]   ;;  %v1220_v34 = vld [vmem:[#allocation5 + $0x64] ss:$8 sps:$4 sm:$0xff]  }
  0x42   :  { %1174 = vset.pattern.permute.xlu0 %v1389_v11  ;;  %127 = vperm.xlu1 %1175, %v88_v3   ;;  %v1222_v35 = vld [vmem:[#allocation5 + $0x60] ss:$8 sps:$4 sm:$0xff]   ;;  %v1223_v36 = vld [vmem:[#allocation5 + $0x74] ss:$8 sps:$4 sm:$0xff]   ;;  %v1225_v37 = vld [vmem:[#allocation5 + $0x70] ss:$8 sps:$4 sm:$0xff]  }
  0x43   :  { %123 = vperm.xlu0 %1174, %v87_v2   ;;  %279 = vmatpush1.bf16.msra.mxu0 %v1186_v9  ;;  %v1226_v38 = vld [vmem:[#allocation5 + $0x84] ss:$8 sps:$4 sm:$0xff]   ;;  %v1228_v39 = vld [vmem:[#allocation5 + $0x80] ss:$8 sps:$4 sm:$0xff]   ;;  %v1229_v40 = vld [vmem:[#allocation5 + $0x94] ss:$8 sps:$4 sm:$0xff]  }
  0x44   :  { %280 = vmatprep.subr.bf16.mxu0 %v1187_v10  ;;  %530 = vmatpush1.bf16.msra.mxu1 %v1207_v25  ;;  %v1231_v41 = vld [vmem:[#allocation5 + $0x90] ss:$8 sps:$4 sm:$0xff]   ;;  %v1232_v42 = vld [vmem:[#allocation5 + $0xa4] ss:$8 sps:$4 sm:$0xff]   ;;  %v1234_v43 = vld [vmem:[#allocation5 + $0xa0] ss:$8 sps:$4 sm:$0xff]  }
  0x45   :  { %531 = vmatprep.subr.bf16.mxu1 %v1208_v26  ;;  %v1235_v44 = vld [vmem:[#allocation5 + $0xb4] ss:$8 sps:$4 sm:$0xff]   ;;  %v1237_v45 = vld [vmem:[#allocation5 + $0xb0] ss:$8 sps:$4 sm:$0xff]   ;;  %v1238_v46 = vld [vmem:[#allocation5 + $0xc4] ss:$8 sps:$4 sm:$0xff]  }
  0x46   :  { %1176 = vset.pattern.permute.xlu1 %v1390_v14  ;;  %v1240_v47 = vld [vmem:[#allocation5 + $0xc0] ss:$8 sps:$4 sm:$0xff]   ;;  %v1241_v48 = vld [vmem:[#allocation5 + $0xd4] ss:$8 sps:$4 sm:$0xff]   ;;  %v101_v50 = vshrl.u32 %v100_v49, 7  ;;  %vm1392_vm0 = vmmov 0  }
  0x47   :  { %1177 = vset.pattern.permute.xlu0 %v1390_v14  ;;  %139 = vperm.xlu1 %1176, %v87_v2   ;;  %v89_v55 = vld [vmem:[%s1649_s1] sm:$0xf]  ;;  %v1244_v25 = vld [vmem:[#allocation5 + $0xe4] ss:$8 sps:$4 sm:$0xff]   ;;  %v1246_v26 = vld [vmem:[#allocation5 + $0xe0] ss:$8 sps:$4 sm:$0xff]  }
  0x48   :  { %143 = vperm.xlu0 %1177, %v88_v3   ;;  %281 = vmatpush1.bf16.msra.mxu0 %v1189_v12  ;;  %v1516_v53 = vsub.s32 1, %v101_v50  ;;  %v1518_v54 = vsub.s32 0, %v101_v50  ;;  %v132_v56 = vsub.s32 2, %v101_v50  ;;  %v148_v62 = vsub.s32 3, %v101_v50 }
  0x49   :  { %282 = vmatprep.subr.bf16.mxu0 %v1190_v13  ;;  %532 = vmatpush1.bf16.msra.mxu1 %v1210_v27  ;;  %v1247_v27 = vld [vmem:[#allocation5 + $0xf4] ss:$8 sps:$4 sm:$0xff]   ;;  %vm909_vm1 = vcmask 523264  }
  0x4a   :  { %533 = vmatprep.subr.bf16.mxu1 %v1211_v28  ;;  %v117_v59 = vrot.slane %v89_v55, %v1516_v53  ;;  %v103_v60 = vrot.slane %v89_v55, %v1518_v54  ;;  %v133_v61 = vrot.slane %v89_v55, %v132_v56  ;;  %v149_v7 = vrot.slane %v89_v55, %v148_v62  ;;  %v1249_v28 = vld [vmem:[#allocation5 + $0xf0] ss:$8 sps:$4 sm:$0xff]   ;;  %v1264_v62 = vld [vmem:[%s1655_s7 + $0x78] sm:$0xff]  }
  0x4c   :  { %283 = vmatpush1.bf16.msra.mxu0 %v1192_v15 }
  0x4d   :  { %284 = vmatprep.subr.bf16.mxu0 %v1193_v16  ;;  %534 = vmatpush1.bf16.msra.mxu1 %v1213_v29  ;;  %v1000_v16 = vld [vmem:[%s1650_s2] ss:$0 sm:$0xff] }
  0x4e   :  { %535 = vmatprep.subr.bf16.mxu1 %v1214_v30  ;;  %v1250_v29 = vld [vmem:[%s1655_s7 + $0x40] sm:$0xff]  }
  0x4f   :  { %v1251_v30 = vld [vmem:[%s1655_s7] sm:$0xff]  }
  0x50   :  { %285 = vmatpush1.bf16.msra.mxu0 %v1195_v17 }
  0x51   :  { %286 = vmatprep.subr.bf16.mxu0 %v1196_v18  ;;  %536 = vmatpush1.bf16.msra.mxu1 %v1216_v31  ;;  %v1252_v31 = vld [vmem:[%s1655_s7 + $0x48] sm:$0xff]  }
  0x52   :  { %537 = vmatprep.subr.bf16.mxu1 %v1217_v32  ;;  %v1253_v32 = vld [vmem:[%s1655_s7 + $0x8] sm:$0xff]  }
  0x54   :  { %287 = vmatpush1.bf16.msra.mxu0 %v1198_v19 }
  0x55   :  { %288 = vmatprep.subr.bf16.mxu0 %v1199_v20  ;;  %538 = vmatpush1.bf16.msra.mxu1 %v1219_v33  ;;  %v1254_v33 = vld [vmem:[%s1655_s7 + $0x50] sm:$0xff]  }
  0x56   :  { %539 = vmatprep.subr.bf16.mxu1 %v1220_v34  ;;  %v1255_v34 = vld [vmem:[%s1655_s7 + $0x10] sm:$0xff]  }
  0x58   :  { %289 = vmatpush1.bf16.msra.mxu0 %v1201_v24  ;;  %v1243_v24 = vld [vmem:[#allocation5 + $0xd0] ss:$8 sps:$4 sm:$0xff]  }
  0x59   :  { %540 = vmatpush1.bf16.msra.mxu1 %v1222_v35  ;;  %1090 = vmatprep.subr.bf16.mxu0 %v1250_v29  ;;  %v1256_v35 = vld [vmem:[%s1655_s7 + $0x58] sm:$0xff]  }
  0x5a   :  { %541 = vmatprep.subr.bf16.mxu1 %v1223_v36  ;;  %v1257_v36 = vld [vmem:[%s1655_s7 + $0x18] sm:$0xff]  }
  0x5d   :  { %542 = vmatpush1.bf16.msra.mxu1 %v1225_v37  ;;  %v1258_v37 = vld [vmem:[%s1655_s7 + $0x60] sm:$0xff]  }
  0x5e   :  { %543 = vmatprep.subr.bf16.mxu1 %v1226_v38  ;;  %v1259_v38 = vld [vmem:[%s1655_s7 + $0x20] sm:$0xff]  }
  0x61   :  { %544 = vmatpush1.bf16.msra.mxu1 %v1228_v39  ;;  %v1260_v39 = vld [vmem:[%s1655_s7 + $0x68] sm:$0xff]  }
  0x62   :  { %545 = vmatprep.subr.bf16.mxu1 %v1229_v40  ;;  %v182_v40 = vld [vmem:[%s1652_s4] sm:$0x3] }
  0x65   :  { %546 = vmatpush1.bf16.msra.mxu1 %v1231_v41  ;;  %v187_v41 = vrot.slane %v182_v40, %v1518_v54 }
  0x66   :  { %547 = vmatprep.subr.bf16.mxu1 %v1232_v42  ;;  %v191_v42 = vrot.slane %v182_v40, %v1516_v53  ;;  %v1066_v40 = vld [vmem:[%s1658_s10] ss:$0 sm:$0xff]  ;;  %s1393_s10 = smov [#allocation8]  }
  0x69   :  { %548 = vmatpush1.bf16.msra.mxu1 %v1234_v43 }
  0x6a   :  { %549 = vmatprep.subr.bf16.mxu1 %v1235_v44 }
  0x6d   :  { %550 = vmatpush1.bf16.msra.mxu1 %v1237_v45 }
  0x6e   :  { %551 = vmatprep.subr.bf16.mxu1 %v1238_v46 }
  0x71   :  { %552 = vmatpush1.bf16.msra.mxu1 %v1240_v47 }
  0x72   :  { %553 = vmatprep.subr.bf16.mxu1 %v1241_v48 }
  0x75   :  { %554 = vmatpush1.bf16.msra.mxu1 %v1243_v24  ;;  %v1274_v24 = vld [vmem:[#allocation7] sm:$0xff]  }
  0x76   :  { %555 = vmatprep.subr.bf16.mxu1 %v1244_v25  ;;  %v1275_v25 = vld [vmem:[#allocation7 + $0x8] sm:$0xff]  }
  0x79   :  { %556 = vmatpush1.bf16.msra.mxu1 %v1246_v26 }
  0x7a   :  { %557 = vmatprep.subr.bf16.mxu1 %v1247_v27  ;;  %v1049_v27 = vld [vmem:[%s1656_s8] ss:$0 sm:$0xff] }
  0x7d   :  { %558 = vmatpush1.bf16.msra.mxu1 %v1249_v28 }
  0xb8   :  { %v108_v51 = vpop.permute.xlu1 %107 }
  0xb9   :  { %v93_v52 = vpop.permute.xlu0 %92  ;;  %v118_v63 = vmul.f32 %v117_v59, %v108_v51 }
  0xba   :  { %v104_v0 = vmul.f32 %v103_v60, %v93_v52 }
  0xbc   :  { %v112_v57 = vpop.permute.xlu1 %111  ;;  %v120_v8 = vadd.f32 %v118_v63, %v104_v0  ;;  %v1265_v63 = vld [vmem:[%s1655_s7 + $0x38] sm:$0xff]   ;;  %v1391_v0 = vmov 0.0  }
  0xbd   :  { %v98_v58 = vpop.permute.xlu0 %97  ;;  %v119_v1 = vmul.f32 %v117_v59, %v112_v57  ;;  %v1261_v59 = vld [vmem:[%s1655_s7 + $0x28] sm:$0xff]   ;;  %1146 = vmatprep.subr.bf16.mxu1 %v1391_v0 }
  0xbe   :  { %v105_v2 = vmul.f32 %v103_v60, %v98_v58  ;;  %v1262_v60 = vld [vmem:[%s1655_s7 + $0x70] sm:$0xff]  }
  0xc0   :  { %v121_v9 = vadd.f32 %v119_v1, %v105_v2  ;;  %v355_v1 = vld [vmem:[%s1654_s6] sm:$0x3] }
  0xc1   :  { %v128_v3 = vpop.permute.xlu1 %127  ;;  %v360_v2 = vrot.slane %v355_v1, %v1518_v54  ;;  %v1266_v54 = vld [vmem:[%s1657_s9] sm:$0xff]  }
  0xc2   :  { %v124_v4 = vpop.permute.xlu0 %123  ;;  %v135_v5 = vmul.f32 %v133_v61, %v128_v3  ;;  %v364_v3 = vrot.slane %v355_v1, %v1516_v53  ;;  %v1267_v53 = vld [vmem:[%s1657_s9 + $0x8] sm:$0xff]  }
  0xc3   :  { %v134_v6 = vmul.f32 %v133_v61, %v124_v4  ;;  %v1263_v61 = vld [vmem:[%s1655_s7 + $0x30] sm:$0xff]  }
  0xc4   :  { %v137_v12 = vadd.f32 %v135_v5, %v121_v9 }
  0xc5   :  { %v136_v13 = vadd.f32 %v134_v6, %v120_v8 }
  0xc6   :  { %v140_v10 = vpop.permute.xlu1 %139 }
  0xc7   :  { %v144_v11 = vpop.permute.xlu0 %143  ;;  %v150_v14 = vmul.f32 %v149_v7, %v140_v10 }
  0xc8   :  { %v151_v15 = vmul.f32 %v149_v7, %v144_v11 }
  0xc9   :  { %v152_v17 = vadd.f32 %v150_v14, %v136_v13 }
  0xca   :  { %v153_v18 = vadd.f32 %v151_v15, %v137_v12 }
  0xcb   :  { %v161_v19 = vadd.f32 %v1000_v16, %v152_v17 }
  0xcc   :  { %v162_v20 = vadd.f32 %v1000_v16, %v153_v18  ;;  %v1268_v18 = vld [vmem:[%s1657_s9 + $0x10] sm:$0xff]  }
  0xcd   :  { %v163_v21 = vmax.f32 %v161_v19, 0.0  ;;  %v1269_v19 = vld [vmem:[%s1657_s9 + $0x18] sm:$0xff]  }
  0xce   :  { %v164_v22 = vmax.f32 %v162_v20, 0.0  ;;  %v1270_v20 = vld [vmem:[%s1657_s9 + $0x20] sm:$0xff]  }
  0xd0   :  { %v165_v23 = vpack.c.bf16 %v164_v22, %v163_v21  ;;  %v1271_v21 = vld [vmem:[%s1657_s9 + $0x28] sm:$0xff]   ;;  %v1272_v22 = vld [vmem:[%s1657_s9 + $0x30] sm:$0xff]  }
  0xd2   :  { %307 = vmatmul.mubr.bf16.vlgmr.msra.gmra.mrb[0].mxu0 %v165_v23  ;;  %v1273_v23 = vld [vmem:[%s1657_s9 + $0x38] sm:$0xff]  }
  0xd3   :  { %1091 = vmatpush3.bf16.msra.mxu0 %v1251_v30 }
  0xd4   :  { %1092 = vmatprep.subr.bf16.mxu0 %v1252_v31 }
  0xd7   :  { %1093 = vmatpush3.bf16.msra.mxu0 %v1253_v32 }
  0xd8   :  { %1094 = vmatprep.subr.bf16.mxu0 %v1254_v33 }
  0xdb   :  { %1095 = vmatpush3.bf16.msra.mxu0 %v1255_v34 }
  0xdc   :  { %1096 = vmatprep.subr.bf16.mxu0 %v1256_v35 }
  0xdf   :  { %1097 = vmatpush3.bf16.msra.mxu0 %v1257_v36 }
  0xe0   :  { %1098 = vmatprep.subr.bf16.mxu0 %v1258_v37 }
  0xe3   :  { %1099 = vmatpush3.bf16.msra.mxu0 %v1259_v38  ;;  %v1276_v38 = vld [vmem:[#allocation7 + $0x10] sm:$0xff]  }
  0xe4   :  { %1100 = vmatprep.subr.bf16.mxu0 %v1260_v39  ;;  %v1277_v39 = vld [vmem:[#allocation7 + $0x18] sm:$0xff]  }
  0xe7   :  { %1101 = vmatpush3.bf16.msra.mxu0 %v1261_v59 }
  0xe8   :  { %1102 = vmatprep.subr.bf16.mxu0 %v1262_v60 }
  0xeb   :  { %1103 = vmatpush3.bf16.msra.mxu0 %v1263_v61 }
  0xec   :  { %1104 = vmatprep.subr.bf16.mxu0 %v1264_v62 }
  0xef   :  { %1105 = vmatpush3.bf16.msra.mxu0 %v1265_v63 }
  0xf0   :  { %1126 = vmatprep.subr.bf16.mxu0 %v1391_v0 }
 0x1a5   :  { %v308_v43 = vpop.f32.mrb[0].mxu0 }
 0x1a6   :  { %v309_v44 = vadd.f32 %v308_v43, %v187_v41  ;;  %v310_v45 = vpop.f32.mrb[1].mxu0 }
 0x1a7   :  { %v311_v46 = vadd.f32 %v310_v45, %v191_v42  ;;  %v312_v47 = vpop.f32.mrb[2].mxu0 }
 0x1a8   :  { %v313_v48 = vadd.f32 %v312_v47, %v187_v41  ;;  %v314_v49 = vpop.f32.mrb[3].mxu0  ;;  %v317_v51 = vmax.f32 %v309_v44, 0.0 }
 0x1a9   :  { %v315_v50 = vadd.f32 %v314_v49, %v191_v42  ;;  %v318_v55 = vmax.f32 %v311_v46, 0.0 }
 0x1aa   :  { %v319_v52 = vmax.f32 %v313_v48, 0.0 }
 0x1ab   :  { %v320_v56 = vmax.f32 %v315_v50, 0.0  ;;  %v1075_v50 = vld [vmem:[%s1660_s12] ss:$0 sm:$0xff]  ;;  %s987_s12 = sshll.u32 %s1393_s10, 4  ;;  %s988_s12 = int_to_ptr.vmem [resolvable:$true] %s987_s12 }
 0x1ac   :  { %v321_v57 = vpack.c.bf16 %v319_v52, %v317_v51  ;;  %s1352_s30 = scalar_lea.vmem %s988_s12, 128  ;;  %p1357_p11 = scmp.lt.s32.totalorder %s988_s12, %s988_s12 }
 0x1ad   :  { %v322_v58 = vpack.c.bf16 %v320_v56, %v318_v55  ;;  %p1353_p10 = scmp.ne.s32.totalorder %s988_s12, %s1352_s30  ;;  %p1358_p12 = scmp.lt.s32.totalorder %s1352_s30, %s1352_s30 }
 0x1af   :  { %559 = vmatprep.mubr.bf16.mxu1 %v322_v58  ;;  %p1359_p13 = por %p1358_p12, %p1357_p11 }
 0x1b0   :  { %560 = vmatmul.mubr.bf16.vlgmr.msra.gmra.mrb[0].mxu1 %v321_v57 }
 0x1b1   :  { %1154 = vmatprep.mubr.msk.bf16.mxu1 %vm1392_vm0, %v1391_v0  ;;  %1147 = vmatpush3.bf16.msra.mxu1 %v1274_v24  ;;  %p1360_p0 = pnand %p1359_p13, %p1353_p10 }
 0x1b2   :  { %1148 = vmatprep.subr.bf16.mxu1 %v1391_v0 }
 0x1b5   :  { %1149 = vmatpush3.bf16.msra.mxu1 %v1275_v25 }
 0x1b6   :  { %1150 = vmatprep.subr.bf16.mxu1 %v1391_v0 }
 0x1b9   :  { %1151 = vmatpush3.bf16.msra.mxu1 %v1276_v38 }
 0x1ba   :  { %1152 = vmatprep.subr.bf16.mxu1 %v1391_v0 }
 0x1bd   :  { %1153 = vmatpush3.bf16.msra.mxu1 %v1277_v39 }
 0x283   :  { %v561_v4 = vpop.f32.mrb[0].mxu1 }
 0x284   :  { %v562_v5 = vadd.f32 %v561_v4, %v360_v2  ;;  %v563_v6 = vpop.f32.mrb[1].mxu1 }
 0x285   :  { %v564_v7 = vadd.f32 %v563_v6, %v364_v3  ;;  %v565_v8 = vpop.f32.mrb[2].mxu1 }
 0x286   :  { %v566_v9 = vadd.f32 %v565_v8, %v360_v2  ;;  %v567_v10 = vpop.f32.mrb[3].mxu1  ;;  %v570_v12 = vmax.f32 %v562_v5, 0.0 }
 0x287   :  { %v568_v11 = vadd.f32 %v567_v10, %v364_v3  ;;  %v571_v14 = vmax.f32 %v564_v7, 0.0 }
 0x288   :  { %v572_v13 = vmax.f32 %v566_v9, 0.0 }
 0x289   :  { %v573_v15 = vmax.f32 %v568_v11, 0.0 }
 0x28a   :  { %v574_v16 = vpack.c.bf16 %v572_v13, %v570_v12 }
 0x28b   :  { %v575_v17 = vpack.c.bf16 %v573_v15, %v571_v14 }
 0x28d   :  { %743 = vmatprep.mubr.bf16.mxu0 %v575_v17 }
 0x28e   :  { %744 = vmatmul.mubr.bf16.vlgmr.msra.gmra.mrb[4].mxu0 %v574_v16 }
 0x28f   :  { %1127 = vmatpush3.bf16.msra.mxu0 %v1266_v54  ;;  %1142 = vmatprep.mubr.msk.bf16.mxu0 %vm1392_vm0, %v1391_v0 }
 0x290   :  { %1128 = vmatprep.subr.bf16.mxu0 %v1391_v0 }
 0x293   :  { %1129 = vmatpush3.bf16.msra.mxu0 %v1267_v53 }
 0x294   :  { %1130 = vmatprep.subr.bf16.mxu0 %v1391_v0 }
 0x297   :  { %1131 = vmatpush3.bf16.msra.mxu0 %v1268_v18 }
 0x298   :  { %1132 = vmatprep.subr.bf16.mxu0 %v1391_v0 }
 0x29b   :  { %1133 = vmatpush3.bf16.msra.mxu0 %v1269_v19 }
 0x29c   :  { %1134 = vmatprep.subr.bf16.mxu0 %v1391_v0 }
 0x29f   :  { %1135 = vmatpush3.bf16.msra.mxu0 %v1270_v20 }
 0x2a0   :  { %1136 = vmatprep.subr.bf16.mxu0 %v1391_v0 }
 0x2a3   :  { %1137 = vmatpush3.bf16.msra.mxu0 %v1271_v21 }
 0x2a4   :  { %1138 = vmatprep.subr.bf16.mxu0 %v1391_v0 }
 0x2a7   :  { %1139 = vmatpush3.bf16.msra.mxu0 %v1272_v22 }
 0x2a8   :  { %1140 = vmatprep.subr.bf16.mxu0 %v1391_v0 }
 0x2ab   :  { %1141 = vmatpush3.bf16.msra.mxu0 %v1273_v23 }
 0x361   :  { %v1106_v26 = vpop.f32.mrb[4].mxu0 }
 0x362   :  { %v1107_v28 = vpop.f32.mrb[5].mxu0 }
 0x363   :  { %v1108_v29 = vadd.f32 %v1107_v28, %v1106_v26  ;;  %v1109_v30 = vpop.f32.mrb[6].mxu0 }
 0x364   :  { %v1110_v31 = vpop.f32.mrb[7].mxu0 }
 0x365   :  { %v746_v32 = vadd.f32 %v1108_v29, %v1049_v27  ;;  %v1111_v33 = vadd.f32 %v1110_v31, %v1109_v30 }
 0x367   :  { %v749_v34 = vadd.f32 %v1111_v33, %v1049_v27  ;;  %v752_v35 = vmax.f32 %v746_v32, 0.0 }
 0x369   :  { %v753_v36 = vmax.f32 %v749_v34, 0.0 }
 0x36b   :  { %v754_v37 = vpack.c.bf16 %v753_v36, %v752_v35 }
 0x36d   :  { %1143 = vmatmul.mubr.bf16.vlgmr.msra.gmra.mrb[8].mxu0 %v754_v37 }
 0x440   :  { %v860_v41 = vpop.f32.mrb[8].mxu0 }
 0x441   :  { %v861_v42 = vadd.f32 %v1066_v40, %v860_v41  ;;  %v1144_v43 = vpop.f32.mrb[9].mxu0 }
 0x442   :  { %v863_v44 = vpop.f32.mrb[10].mxu0 }
 0x443   :  { %v864_v45 = vadd.f32 %v1066_v40, %v863_v44  ;;  %v1145_v46 = vpop.f32.mrb[11].mxu0  ;;  %v867_v47 = vmax.f32 %v861_v42, 0.0 }
 0x445   :  { %v868_v48 = vmax.f32 %v864_v45, 0.0 }
 0x447   :  { %v869_v49 = vpack.c.bf16 %v868_v48, %v867_v47 }
 0x449   :  { %1155 = vmatmul.mubr.msk.bf16.vlgmr.msra.gmra.mrb[4].mxu1 %vm909_vm1, %v869_v49 }
 0x51c   :  { %v947_v51 = vpop.f32.mrb[4].mxu1 }
 0x51d   :  { %v948_v52 = vadd.f32 %v1075_v50, %v947_v51  ;;  %v1156_v55 = vpop.f32.mrb[5].mxu1 }
 0x51e   :  { %v950_v56 = vpop.f32.mrb[6].mxu1 }
 0x51f   :  { %v951_v57 = vadd.f32 %v1075_v50, %v950_v56  ;;  %954 = vmax.xlane.f32.xlu1 %v948_v52  ;;  %v1157_v58 = vpop.f32.mrb[7].mxu1 }
 0x521   :  { %956 = vmax.xlane.f32.xlu0 %v951_v57 }
 0x5ac   :  { %v955_v59 = vpop.xlane.xlu1 %954 }
 0x5ad   :  { %v958_v60 = vsub.f32 %v948_v52, %v955_v59 }
 0x5ae   :  { %v957_v61 = vpop.xlane.xlu0 %956 }
 0x5af   :  { %v960_v62 = vmul.f32 1.442695, %v958_v60  ;;  %v959_v63 = vsub.f32 %v951_v57, %v957_v61 }
 0x5b1   :  { %1278 = vpow2.f32 %v960_v62  ;;  %v962_v0 = vmul.f32 1.442695, %v959_v63 }
 0x5b3   :  { %1280 = vpow2.f32 %v962_v0 }
 0x5bb   :  { %v1279_v1 = vpop.eup %1278 }
 0x5bc   :  { %964 = vadd.xlane.f32.xlu1 %v1279_v1 }
 0x5bd   :  { %v1281_v2 = vpop.eup %1280 }
 0x5be   :  { %966 = vadd.xlane.f32.xlu0 %v1281_v2 }
 0x649   :  { %v965_v3 = vpop.xlane.xlu1 %964 }
 0x64a   :  { %1282 = vrcp.f32 %v965_v3 }
 0x64b   :  { %v967_v4 = vpop.xlane.xlu0 %966 }
 0x64c   :  { %1284 = vrcp.f32 %v967_v4 }
 0x654   :  { %v1283_v5 = vpop.eup %1282 }
 0x655   :  { %v970_v7 = vmul.f32 %v1283_v5, %v1279_v1 }
 0x656   :  { %v1285_v6 = vpop.eup %1284 }
 0x657   :  { %v971_v8 = vmul.f32 %v1285_v6, %v1281_v2 }
 0x659   :  { %v1088_v9 = vpack.c.bf16 %v971_v8, %v970_v7 }
 0x65b   :  { %1089 = vst [vmem:[#allocation8] sm:$0xff] %v1088_v9  }
 0x65c   :  { %1363 = shalt.err (!%p1360_p0)
}
 0x65d   :  { %s1364_s14 = scalar_lea.hbm %s1661_s13, 128 }
 0x65e   :  { %p1365_p1 = scmp.ne.s32.totalorder %s1661_s13, %s1364_s14  ;;  %p1368_p2 = scmp.lt.u32.totalorder %s1364_s14, %s1661_s13 }
 0x660   :  { %p1370_p3 = pnand %p1368_p2, %p1365_p1 }
 0x662   :  { %1373 = shalt.err (!%p1370_p3)
}
 0x663   :  { %993 = dma.vmem_to_hbm [thread:$0]  %s988_s12, 128, %s1661_s13, [#allocation4], %s1385_s3, %s1385_s3, %s1386_s28  }
 0x664   :  { %1378 = dma.done.wait [#allocation4], 128  }
 0x665   :  { %1379 = vsyncadd [#allocation4], 4294967168 }
 0x666   :  { %997 = vsyncpa [#allocation3], 1 }
 0x667   :  { %998 = vsyncpa [#allocation6], 1 }
 0x668   :  { %999 = vsyncpa [#allocation4], 1 }

</bundles_post_ra>
